<compile_context>
chip_gen: v6e
topology: v6e:2x2x1
jax: 0.10.0
libtpu: 0.0.40
codegen_flags: <defaults>
</compile_context>

<pallas_src>
import functools

import numpy as np
import jax
import jax.numpy as jnp
from jax.experimental import pallas as pl
from jax.experimental.pallas import tpu as pltpu

EPS = 1e-5
LANE = 128
SUBLANE = 8


def _round_up(n, m):
    return ((n + m - 1) // m) * m


# --------------------------------- kernel ----------------------------------

def shufflenet_unit_kernel(x_ref, w1sc_ref, w2_ref, pmid_ref, pout_ref,
                           out_ref, *, n_valid, seq_len, mid, mid_pad, out_ch):
    """Activations live as lane-dense (C, Npad) slabs, Npad % 128 == 0.

    x_ref     : (Cin, Npad) bf16 — zero-padded columns beyond n_valid.
    w1sc_ref  : (mid_pad + out_pad, Cin) bf16 — rows [0:mid] = gconv1 (block-
                diagonal dense), rows [mid_pad:mid_pad+out_ch] = shortcut 1x1.
    w2_ref    : (out_ch, mid) bf16 — gconv2 dense, shuffle folded into cols.
    pmid_ref  : (mid, 7) f32  — g1, bt1, w_l, w_c, w_r, g2, bt2.
    pout_ref  : (out_ch, 4) f32 — gsc, btsc, g3, bt3.
    """
    f32 = jnp.float32
    inv_n = 1.0 / float(n_valid)
    npad = x_ref.shape[-1]

    # ---- masks built in-kernel (iota + compares): no mask DMA / VMEM slab.
    col = jax.lax.broadcasted_iota(jnp.int32, (1, npad), 1)
    pos = col % seq_len                                  # position within sample
    is_valid = col < n_valid
    valid = is_valid.astype(f32)                         # non-padding column
    has_left = (is_valid & (pos != 0)).astype(f32)       # l-1 in same sample
    has_right = (is_valid & (pos != seq_len - 1)).astype(f32)

    pm = pmid_ref[...]                                   # (mid, 7)
    po = pout_ref[...]                                   # (out_ch, 4)
    g1, bt1 = pm[:, 0:1], pm[:, 1:2]
    w_l, w_c, w_r = pm[:, 2:3], pm[:, 3:4], pm[:, 4:5]
    g2, bt2 = pm[:, 5:6], pm[:, 6:7]
    gsc, btsc = po[:, 0:1], po[:, 1:2]
    g3, bt3 = po[:, 2:3], po[:, 3:4]

    def bn(v, gamma, beta):
        # Training-mode BN, one data pass. Padded columns excluded via `valid`,
        # sums / sum-of-squares kept in f32, biased variance, rsqrt -> EUP.
        # Affine folded into a single slab FMA: v*scale + shift.
        vm = v * valid
        s = jnp.sum(vm, axis=-1, keepdims=True)
        ss = jnp.sum(vm * vm, axis=-1, keepdims=True)
        mean = s * inv_n
        var = ss * inv_n - mean * mean
        scale = jax.lax.rsqrt(var + EPS) * gamma
        shift = beta - mean * scale
        return v * scale + shift

    # ---- fused [gconv1 ; shortcut 1x1]: ONE bf16 MXU matmul over the x slab.
    # Conv biases are dropped: training-mode BN absorbs them exactly.
    yc = jnp.dot(w1sc_ref[...], x_ref[...],
                 preferred_element_type=jnp.float32)     # (rows, Npad) f32

    # gconv1 branch: BN1 + ReLU.
    y = jnp.maximum(bn(yc[0:mid, :], g1, bt1), 0.0)      # (mid, Npad)

    # ---- channel shuffle: folded into dw/bn2/gconv2 params by the wrapper.

    # ---- depthwise conv k=3 pad=1: XLU rolls + boundary masks (no concats).
    y_l = pltpu.roll(y, shift=1, axis=1) * has_left          # y[l-1]
    y_r = pltpu.roll(y, shift=npad - 1, axis=1) * has_right  # y[l+1]
    z = bn(w_l * y_l + w_c * y + w_r * y_r, g2, bt2)

    # ---- gconv2 (bf16 MXU feed, shuffle folded) + BN3.
    o = jnp.dot(w2_ref[...], z.astype(jnp.bfloat16),
                preferred_element_type=jnp.float32)
    o = bn(o, g3, bt3)

    # ---- shortcut BN + residual add (all f32).
    r = bn(yc[mid_pad:mid_pad + out_ch, :], gsc, btsc)
    out_ref[...] = (o + r).astype(out_ref.dtype)


# ------------------------------ JAX wrapper --------------------------------

def block_diag(w_grouped, groups):
    """Grouped-conv weight (Cout, Cin//g) -> dense block-diagonal (Cout, Cin)."""
    cout, cin_pg = w_grouped.shape
    cout_pg = cout // groups
    W = jnp.zeros((cout, cin_pg * groups), dtype=w_grouped.dtype)
    for g in range(groups):
        W = W.at[g * cout_pg:(g + 1) * cout_pg,
                 g * cin_pg:(g + 1) * cin_pg].set(
            w_grouped[g * cout_pg:(g + 1) * cout_pg])
    return W


def shufflenet_unit_forward(x, p, groups):
    B, Cin, L = x.shape
    out_ch = p['wsc'].shape[0]
    mid = p['w1'].shape[0]
    N = B * L
    Npad = _round_up(N, LANE)                 # lane-dense slab width
    mid_pad = _round_up(mid, SUBLANE)         # aligned start of shortcut rows
    f32, bf16 = jnp.float32, jnp.bfloat16

    # Dense block-diagonal weights for the grouped 1x1 convs.
    # TODO(synk): at production group counts, use per-group pl.ds dots instead
    # of the dense block-diagonal fold (avoids groups-x FLOP/byte inflation).
    W1 = block_diag(p['w1'], groups).astype(f32)     # (mid, Cin)
    W2 = block_diag(p['w2'], groups).astype(f32)     # (out, mid)

    # Fold the channel shuffle (static permutation) into downstream params.
    cpg = mid // groups
    perm = np.array([(c % groups) * cpg + (c // groups) for c in range(mid)])
    inv_perm = np.argsort(perm)
    wdw = p['wdw'][inv_perm]                          # (mid, 3)
    g2 = p['g2'][inv_perm]
    bt2 = p['bt2'][inv_perm]
    W2 = W2[:, inv_perm]

    # Fused first-matmul weight: [W1 ; zero-pad ; Wsc], bf16 MXU feed.
    rows = mid_pad + _round_up(out_ch, SUBLANE)
    W1sc = jnp.zeros((rows, Cin), f32)
    W1sc = W1sc.at[:mid].set(W1)
    W1sc = W1sc.at[mid_pad:mid_pad + out_ch].set(p['wsc'].astype(f32))

    # Per-channel params packed into 2 small f32 slabs (2 DMAs).
    # Conv biases are intentionally omitted (absorbed by training-mode BN).
    pmid = jnp.stack([p['g1'], p['bt1'],
                      wdw[:, 0], wdw[:, 1], wdw[:, 2],
                      g2, bt2], axis=1).astype(f32)               # (mid, 7)
    pout = jnp.stack([p['gsc'], p['btsc'],
                      p['g3'], p['bt3']], axis=1).astype(f32)     # (out, 4)

    # Activations as a lane-dense (Cin, B*L) slab, zero-padded, bf16 feed.
    x2d = x.transpose(1, 0, 2).reshape(Cin, N)
    x2d = jnp.pad(x2d, ((0, 0), (0, Npad - N))).astype(bf16)

    kernel = functools.partial(shufflenet_unit_kernel, n_valid=N, seq_len=L,
                               mid=mid, mid_pad=mid_pad, out_ch=out_ch)

    matmul_flops = 2 * Npad * (rows * Cin + out_ch * mid)
    elementwise_flops = Npad * (24 * mid + 16 * out_ch)
    bytes_accessed = (2 * (Cin * Npad + rows * Cin + out_ch * mid)
                      + 4 * (mid * 7 + out_ch * 4 + out_ch * Npad))
    cost = pl.CostEstimate(flops=int(matmul_flops + elementwise_flops),
                           transcendentals=int(2 * (mid + out_ch)),
                           bytes_accessed=int(bytes_accessed))

    vmem = pl.BlockSpec(memory_space=pltpu.MemorySpace.VMEM)
    out2d = pl.pallas_call(
        kernel,
        out_shape=jax.ShapeDtypeStruct((out_ch, Npad), f32),
        in_specs=[vmem] * 5,
        out_specs=vmem,
        cost_estimate=cost,
    )(x2d, W1sc.astype(bf16), W2.astype(bf16), pmid, pout)

    # Back to NCL layout (cheap XLA reshape/transpose at these sizes).
    return out2d[:, :N].reshape(out_ch, B, L).transpose(1, 0, 2)


# ---------------------------- pure-JAX reference ---------------------------

def ref_forward(x, p, groups):
    def bn(v, gamma, beta):
        mean = v.mean(axis=(0, 2), keepdims=True)
        var = ((v - mean) ** 2).mean(axis=(0, 2), keepdims=True)
        return (v - mean) / jnp.sqrt(var + EPS) * gamma[None, :, None] \
            + beta[None, :, None]

    def conv1x1(Wd, b, v):
        return jnp.einsum('oc,bcl->bol', Wd, v) + b[None, :, None]

    res = bn(conv1x1(p['wsc'], p['bsc'], x), p['gsc'], p['btsc'])
    y = conv1x1(block_diag(p['w1'], groups), p['b1'], x)
    y = jax.nn.relu(bn(y, p['g1'], p['bt1']))
    B, M, L = y.shape
    y = y.reshape(B, groups, M // groups, L).transpose(0, 2, 1, 3).reshape(B, M, L)
    yp = jnp.pad(y, ((0, 0), (0, 0), (1, 1)))
    wdw = p['wdw']
    z = (wdw[:, 0][None, :, None] * yp[:, :, :L]
         + wdw[:, 1][None, :, None] * yp[:, :, 1:L + 1]
         + wdw[:, 2][None, :, None] * yp[:, :, 2:L + 2]
         + p['bdw'][None, :, None])
    z = bn(z, p['g2'], p['bt2'])
    o = bn(conv1x1(block_diag(p['w2'], groups), p['b2'], z), p['g3'], p['bt3'])
    return o + res


# --------------------------------- params ----------------------------------

def init_params(key, in_ch, out_ch, groups):
    mid = out_ch // 4
    ks = jax.random.split(key, 16)
    s = 0.1
    n = lambda k, shape: (s * jax.random.normal(k, shape, jnp.float32))
    return {
        'wsc': n(ks[0], (out_ch, in_ch)), 'bsc': n(ks[1], (out_ch,)),
        'gsc': 1.0 + n(ks[2], (out_ch,)), 'btsc': n(ks[3], (out_ch,)),
        'w1': n(ks[4], (mid, in_ch // groups)), 'b1': n(ks[5], (mid,)),
        'g1': 1.0 + n(ks[6], (mid,)), 'bt1': n(ks[7], (mid,)),
        'wdw': n(ks[8], (mid, 3)), 'bdw': n(ks[9], (mid,)),
        'g2': 1.0 + n(ks[10], (mid,)), 'bt2': n(ks[11], (mid,)),
        'w2': n(ks[12], (out_ch, mid // groups)), 'b2': n(ks[13], (out_ch,)),
        'g3': 1.0 + n(ks[14], (out_ch,)), 'bt3': n(ks[15], (out_ch,)),
    }


# ----------------------------------- main -----------------------------------

if __name__ == "__main__":
    B, in_ch, out_ch, groups, L = 2, 8, 16, 2, 32

    key = jax.random.PRNGKey(0)
    kx, kp = jax.random.split(key)
    x = jax.random.normal(kx, (B, in_ch, L), jnp.float32)
    params = init_params(kp, in_ch, out_ch, groups)

    out = jax.block_until_ready(shufflenet_unit_forward(x, params, groups))

    ref = jax.block_until_ready(ref_forward(x, params, groups))
    assert out.shape == (B, out_ch, L)
    # bf16 MXU feeds (f32 accumulation) -> looser tolerance vs. the f32 ref.
    np.testing.assert_allclose(np.asarray(out), np.asarray(ref),
                               rtol=3e-2, atol=3e-2)
    print("KERNEL_OK")
</pallas_src>

<mosaic_0001>
module attributes {stable_mosaic.version = 11 : i64} {
  func.func @shufflenet_unit_kernel(%arg0: memref<8x128xbf16, #tpu.memory_space<vmem>>, %arg1: memref<24x8xbf16, #tpu.memory_space<vmem>>, %arg2: memref<16x4xbf16, #tpu.memory_space<vmem>>, %arg3: memref<4x7xf32, #tpu.memory_space<vmem>>, %arg4: memref<16x4xf32, #tpu.memory_space<vmem>>, %arg5: memref<16x128xf32, #tpu.memory_space<vmem>>) attributes {dimension_semantics = [], scalar_prefetch = 0 : i64, scratch_operands = 0 : i64, tpu.core_type = #tpu.core_type<tc>} {
    %0 = tpu.iota {dimensions = array<i32: 1>} : vector<1x128xi32>
    %c32_i32 = arith.constant 32 : i32
    %c0_i32 = arith.constant 0 : i32
    %1 = arith.cmpi eq, %c32_i32, %c0_i32 : i32
    %c1_i32 = arith.constant 1 : i32
    %2 = arith.select %1, %c1_i32, %c32_i32 : i32
    %3 = vector.broadcast %2 : i32 to vector<1x128xi32>
    %4 = arith.remsi %0, %3 : vector<1x128xi32>
    %c0_i32_0 = arith.constant 0 : i32
    %5 = vector.broadcast %c0_i32_0 : i32 to vector<1x128xi32>
    %6 = arith.cmpi ne, %4, %5 : vector<1x128xi32>
    %c0_i32_1 = arith.constant 0 : i32
    %7 = vector.broadcast %c0_i32_1 : i32 to vector<1x128xi32>
    %8 = arith.cmpi slt, %4, %7 : vector<1x128xi32>
    %c0_i32_2 = arith.constant 0 : i32
    %9 = arith.cmpi slt, %2, %c0_i32_2 : i32
    %10 = vector.broadcast %9 : i1 to vector<1x128xi1>
    %11 = vector.broadcast %10 : vector<1x128xi1> to vector<1x128xi1>
    %12 = arith.xori %8, %11 : vector<1x128xi1>
    %13 = arith.andi %12, %6 : vector<1x128xi1>
    %14 = vector.broadcast %2 : i32 to vector<1x128xi32>
    %15 = arith.addi %4, %14 : vector<1x128xi32>
    %16 = arith.select %13, %15, %4 : vector<1x128xi1>, vector<1x128xi32>
    %c64_i32 = arith.constant 64 : i32
    %17 = vector.broadcast %c64_i32 : i32 to vector<1x128xi32>
    %18 = arith.cmpi slt, %0, %17 : vector<1x128xi32>
    %19 = arith.extui %18 : vector<1x128xi1> to vector<1x128xi32>
    %20 = arith.sitofp %19 : vector<1x128xi32> to vector<1x128xf32>
    %c0_i32_3 = arith.constant 0 : i32
    %21 = vector.broadcast %c0_i32_3 : i32 to vector<1x128xi32>
    %22 = arith.cmpi ne, %16, %21 : vector<1x128xi32>
    %23 = arith.andi %18, %22 : vector<1x128xi1>
    %24 = arith.extui %23 : vector<1x128xi1> to vector<1x128xi32>
    %25 = arith.sitofp %24 : vector<1x128xi32> to vector<1x128xf32>
    %c31_i32 = arith.constant 31 : i32
    %26 = vector.broadcast %c31_i32 : i32 to vector<1x128xi32>
    %27 = arith.cmpi ne, %16, %26 : vector<1x128xi32>
    %28 = arith.andi %18, %27 : vector<1x128xi1>
    %29 = arith.extui %28 : vector<1x128xi1> to vector<1x128xi32>
    %30 = arith.sitofp %29 : vector<1x128xi32> to vector<1x128xf32>
    %c0 = arith.constant 0 : index
    %c0_4 = arith.constant 0 : index
    %31 = vector.load %arg3[%c0, %c0_4] : memref<4x7xf32, #tpu.memory_space<vmem>>, vector<4x7xf32>
    %c0_5 = arith.constant 0 : index
    %c0_6 = arith.constant 0 : index
    %32 = vector.load %arg4[%c0_5, %c0_6] : memref<16x4xf32, #tpu.memory_space<vmem>>, vector<16x4xf32>
    %33 = vector.extract_strided_slice %31 {offsets = [0, 0], sizes = [4, 1], strides = [1, 1]} : vector<4x7xf32> to vector<4x1xf32>
    %34 = vector.extract_strided_slice %31 {offsets = [0, 1], sizes = [4, 1], strides = [1, 1]} : vector<4x7xf32> to vector<4x1xf32>
    %35 = vector.extract_strided_slice %31 {offsets = [0, 2], sizes = [4, 1], strides = [1, 1]} : vector<4x7xf32> to vector<4x1xf32>
    %36 = vector.extract_strided_slice %31 {offsets = [0, 3], sizes = [4, 1], strides = [1, 1]} : vector<4x7xf32> to vector<4x1xf32>
    %37 = vector.extract_strided_slice %31 {offsets = [0, 4], sizes = [4, 1], strides = [1, 1]} : vector<4x7xf32> to vector<4x1xf32>
    %38 = vector.extract_strided_slice %31 {offsets = [0, 5], sizes = [4, 1], strides = [1, 1]} : vector<4x7xf32> to vector<4x1xf32>
    %39 = vector.extract_strided_slice %31 {offsets = [0, 6], sizes = [4, 1], strides = [1, 1]} : vector<4x7xf32> to vector<4x1xf32>
    %40 = vector.extract_strided_slice %32 {offsets = [0, 0], sizes = [16, 1], strides = [1, 1]} : vector<16x4xf32> to vector<16x1xf32>
    %41 = vector.extract_strided_slice %32 {offsets = [0, 1], sizes = [16, 1], strides = [1, 1]} : vector<16x4xf32> to vector<16x1xf32>
    %42 = vector.extract_strided_slice %32 {offsets = [0, 2], sizes = [16, 1], strides = [1, 1]} : vector<16x4xf32> to vector<16x1xf32>
    %43 = vector.extract_strided_slice %32 {offsets = [0, 3], sizes = [16, 1], strides = [1, 1]} : vector<16x4xf32> to vector<16x1xf32>
    %c0_7 = arith.constant 0 : index
    %c0_8 = arith.constant 0 : index
    %44 = vector.load %arg1[%c0_7, %c0_8] : memref<24x8xbf16, #tpu.memory_space<vmem>>, vector<24x8xbf16>
    %c0_9 = arith.constant 0 : index
    %c0_10 = arith.constant 0 : index
    %45 = vector.load %arg0[%c0_9, %c0_10] : memref<8x128xbf16, #tpu.memory_space<vmem>>, vector<8x128xbf16>
    %cst = arith.constant dense<0.000000e+00> : vector<24x128xf32>
    %46 = tpu.matmul %44, %45, %cst {dimension_numbers = #tpu.dot_dimension_numbers<[1], [0], [0], [1], [0, 0, 1, 1], [], []>} : vector<24x8xbf16>, vector<8x128xbf16>, vector<24x128xf32> -> vector<24x128xf32>
    %47 = vector.extract_strided_slice %46 {offsets = [0, 0], sizes = [4, 128], strides = [1, 1]} : vector<24x128xf32> to vector<4x128xf32>
    %48 = vector.broadcast %20 : vector<1x128xf32> to vector<4x128xf32>
    %49 = arith.mulf %47, %48 : vector<4x128xf32>
    %cst_11 = arith.constant dense<0.000000e+00> : vector<4xf32>
    %50 = vector.multi_reduction <add>, %49, %cst_11 [1] : vector<4x128xf32> to vector<4xf32>
    %51 = vector.shape_cast %50 : vector<4xf32> to vector<4x1xf32>
    %52 = arith.mulf %49, %49 : vector<4x128xf32>
    %cst_12 = arith.constant dense<0.000000e+00> : vector<4xf32>
    %53 = vector.multi_reduction <add>, %52, %cst_12 [1] : vector<4x128xf32> to vector<4xf32>
    %54 = vector.shape_cast %53 : vector<4xf32> to vector<4x1xf32>
    %cst_13 = arith.constant 1.562500e-02 : f32
    %55 = vector.broadcast %cst_13 : f32 to vector<4x1xf32>
    %56 = arith.mulf %51, %55 : vector<4x1xf32>
    %cst_14 = arith.constant 1.562500e-02 : f32
    %57 = vector.broadcast %cst_14 : f32 to vector<4x1xf32>
    %58 = arith.mulf %54, %57 : vector<4x1xf32>
    %59 = arith.mulf %56, %56 : vector<4x1xf32>
    %60 = arith.subf %58, %59 : vector<4x1xf32>
    %cst_15 = arith.constant 9.99999974E-6 : f32
    %61 = vector.broadcast %cst_15 : f32 to vector<4x1xf32>
    %62 = arith.addf %60, %61 : vector<4x1xf32>
    %63 = math.rsqrt %62 : vector<4x1xf32>
    %64 = arith.mulf %63, %33 : vector<4x1xf32>
    %65 = arith.mulf %56, %64 : vector<4x1xf32>
    %66 = arith.subf %34, %65 : vector<4x1xf32>
    %67 = vector.broadcast %64 : vector<4x1xf32> to vector<4x128xf32>
    %68 = arith.mulf %47, %67 : vector<4x128xf32>
    %69 = vector.broadcast %66 : vector<4x1xf32> to vector<4x128xf32>
    %70 = arith.addf %68, %69 : vector<4x128xf32>
    %cst_16 = arith.constant 0.000000e+00 : f32
    %71 = vector.broadcast %cst_16 : f32 to vector<4x128xf32>
    %72 = arith.maximumf %70, %71 : vector<4x128xf32>
    %c1_i32_17 = arith.constant 1 : i32
    %73 = tpu.dynamic_rotate %72 by %c1_i32_17 dim 1 : vector<4x128xf32>, i32 -> vector<4x128xf32>
    %74 = vector.broadcast %25 : vector<1x128xf32> to vector<4x128xf32>
    %75 = arith.mulf %73, %74 : vector<4x128xf32>
    %c127_i32 = arith.constant 127 : i32
    %76 = tpu.dynamic_rotate %72 by %c127_i32 dim 1 : vector<4x128xf32>, i32 -> vector<4x128xf32>
    %77 = vector.broadcast %30 : vector<1x128xf32> to vector<4x128xf32>
    %78 = arith.mulf %76, %77 : vector<4x128xf32>
    %79 = vector.broadcast %35 : vector<4x1xf32> to vector<4x128xf32>
    %80 = arith.mulf %79, %75 : vector<4x128xf32>
    %81 = vector.broadcast %36 : vector<4x1xf32> to vector<4x128xf32>
    %82 = arith.mulf %81, %72 : vector<4x128xf32>
    %83 = arith.addf %80, %82 : vector<4x128xf32>
    %84 = vector.broadcast %37 : vector<4x1xf32> to vector<4x128xf32>
    %85 = arith.mulf %84, %78 : vector<4x128xf32>
    %86 = arith.addf %83, %85 : vector<4x128xf32>
    %87 = vector.broadcast %20 : vector<1x128xf32> to vector<4x128xf32>
    %88 = arith.mulf %86, %87 : vector<4x128xf32>
    %cst_18 = arith.constant dense<0.000000e+00> : vector<4xf32>
    %89 = vector.multi_reduction <add>, %88, %cst_18 [1] : vector<4x128xf32> to vector<4xf32>
    %90 = vector.shape_cast %89 : vector<4xf32> to vector<4x1xf32>
    %91 = arith.mulf %88, %88 : vector<4x128xf32>
    %cst_19 = arith.constant dense<0.000000e+00> : vector<4xf32>
    %92 = vector.multi_reduction <add>, %91, %cst_19 [1] : vector<4x128xf32> to vector<4xf32>
    %93 = vector.shape_cast %92 : vector<4xf32> to vector<4x1xf32>
    %cst_20 = arith.constant 1.562500e-02 : f32
    %94 = vector.broadcast %cst_20 : f32 to vector<4x1xf32>
    %95 = arith.mulf %90, %94 : vector<4x1xf32>
    %cst_21 = arith.constant 1.562500e-02 : f32
    %96 = vector.broadcast %cst_21 : f32 to vector<4x1xf32>
    %97 = arith.mulf %93, %96 : vector<4x1xf32>
    %98 = arith.mulf %95, %95 : vector<4x1xf32>
    %99 = arith.subf %97, %98 : vector<4x1xf32>
    %cst_22 = arith.constant 9.99999974E-6 : f32
    %100 = vector.broadcast %cst_22 : f32 to vector<4x1xf32>
    %101 = arith.addf %99, %100 : vector<4x1xf32>
    %102 = math.rsqrt %101 : vector<4x1xf32>
    %103 = arith.mulf %102, %38 : vector<4x1xf32>
    %104 = arith.mulf %95, %103 : vector<4x1xf32>
    %105 = arith.subf %39, %104 : vector<4x1xf32>
    %106 = vector.broadcast %103 : vector<4x1xf32> to vector<4x128xf32>
    %107 = arith.mulf %86, %106 : vector<4x128xf32>
    %108 = vector.broadcast %105 : vector<4x1xf32> to vector<4x128xf32>
    %109 = arith.addf %107, %108 : vector<4x128xf32>
    %c0_23 = arith.constant 0 : index
    %c0_24 = arith.constant 0 : index
    %110 = vector.load %arg2[%c0_23, %c0_24] : memref<16x4xbf16, #tpu.memory_space<vmem>>, vector<16x4xbf16>
    %111 = arith.truncf %109 : vector<4x128xf32> to vector<4x128xbf16>
    %cst_25 = arith.constant dense<0.000000e+00> : vector<16x128xf32>
    %112 = tpu.matmul %110, %111, %cst_25 {dimension_numbers = #tpu.dot_dimension_numbers<[1], [0], [0], [1], [0, 0, 1, 1], [], []>} : vector<16x4xbf16>, vector<4x128xbf16>, vector<16x128xf32> -> vector<16x128xf32>
    %113 = vector.broadcast %20 : vector<1x128xf32> to vector<16x128xf32>
    %114 = arith.mulf %112, %113 : vector<16x128xf32>
    %cst_26 = arith.constant dense<0.000000e+00> : vector<16xf32>
    %115 = vector.multi_reduction <add>, %114, %cst_26 [1] : vector<16x128xf32> to vector<16xf32>
    %116 = vector.shape_cast %115 : vector<16xf32> to vector<16x1xf32>
    %117 = arith.mulf %114, %114 : vector<16x128xf32>
    %cst_27 = arith.constant dense<0.000000e+00> : vector<16xf32>
    %118 = vector.multi_reduction <add>, %117, %cst_27 [1] : vector<16x128xf32> to vector<16xf32>
    %119 = vector.shape_cast %118 : vector<16xf32> to vector<16x1xf32>
    %cst_28 = arith.constant 1.562500e-02 : f32
    %120 = vector.broadcast %cst_28 : f32 to vector<16x1xf32>
    %121 = arith.mulf %116, %120 : vector<16x1xf32>
    %cst_29 = arith.constant 1.562500e-02 : f32
    %122 = vector.broadcast %cst_29 : f32 to vector<16x1xf32>
    %123 = arith.mulf %119, %122 : vector<16x1xf32>
    %124 = arith.mulf %121, %121 : vector<16x1xf32>
    %125 = arith.subf %123, %124 : vector<16x1xf32>
    %cst_30 = arith.constant 9.99999974E-6 : f32
    %126 = vector.broadcast %cst_30 : f32 to vector<16x1xf32>
    %127 = arith.addf %125, %126 : vector<16x1xf32>
    %128 = math.rsqrt %127 : vector<16x1xf32>
    %129 = arith.mulf %128, %42 : vector<16x1xf32>
    %130 = arith.mulf %121, %129 : vector<16x1xf32>
    %131 = arith.subf %43, %130 : vector<16x1xf32>
    %132 = vector.broadcast %129 : vector<16x1xf32> to vector<16x128xf32>
    %133 = arith.mulf %112, %132 : vector<16x128xf32>
    %134 = vector.broadcast %131 : vector<16x1xf32> to vector<16x128xf32>
    %135 = arith.addf %133, %134 : vector<16x128xf32>
    %136 = vector.extract_strided_slice %46 {offsets = [8, 0], sizes = [16, 128], strides = [1, 1]} : vector<24x128xf32> to vector<16x128xf32>
    %137 = vector.broadcast %20 : vector<1x128xf32> to vector<16x128xf32>
    %138 = arith.mulf %136, %137 : vector<16x128xf32>
    %cst_31 = arith.constant dense<0.000000e+00> : vector<16xf32>
    %139 = vector.multi_reduction <add>, %138, %cst_31 [1] : vector<16x128xf32> to vector<16xf32>
    %140 = vector.shape_cast %139 : vector<16xf32> to vector<16x1xf32>
    %141 = arith.mulf %138, %138 : vector<16x128xf32>
    %cst_32 = arith.constant dense<0.000000e+00> : vector<16xf32>
    %142 = vector.multi_reduction <add>, %141, %cst_32 [1] : vector<16x128xf32> to vector<16xf32>
    %143 = vector.shape_cast %142 : vector<16xf32> to vector<16x1xf32>
    %cst_33 = arith.constant 1.562500e-02 : f32
    %144 = vector.broadcast %cst_33 : f32 to vector<16x1xf32>
    %145 = arith.mulf %140, %144 : vector<16x1xf32>
    %cst_34 = arith.constant 1.562500e-02 : f32
    %146 = vector.broadcast %cst_34 : f32 to vector<16x1xf32>
    %147 = arith.mulf %143, %146 : vector<16x1xf32>
    %148 = arith.mulf %145, %145 : vector<16x1xf32>
    %149 = arith.subf %147, %148 : vector<16x1xf32>
    %cst_35 = arith.constant 9.99999974E-6 : f32
    %150 = vector.broadcast %cst_35 : f32 to vector<16x1xf32>
    %151 = arith.addf %149, %150 : vector<16x1xf32>
    %152 = math.rsqrt %151 : vector<16x1xf32>
    %153 = arith.mulf %152, %40 : vector<16x1xf32>
    %154 = arith.mulf %145, %153 : vector<16x1xf32>
    %155 = arith.subf %41, %154 : vector<16x1xf32>
    %156 = vector.broadcast %153 : vector<16x1xf32> to vector<16x128xf32>
    %157 = arith.mulf %136, %156 : vector<16x128xf32>
    %158 = vector.broadcast %155 : vector<16x1xf32> to vector<16x128xf32>
    %159 = arith.addf %157, %158 : vector<16x128xf32>
    %160 = arith.addf %135, %159 : vector<16x128xf32>
    %c0_36 = arith.constant 0 : index
    %c0_37 = arith.constant 0 : index
    %161 = vector.load %arg5[%c0_36, %c0_37] : memref<16x128xf32, #tpu.memory_space<vmem>>, vector<16x128xf32>
    tpu.vector_store %arg5[%c0_36, %c0_37], %160 {strides = array<i32>} : memref<16x128xf32, #tpu.memory_space<vmem>>, vector<16x128xf32>,
    return
  }
}

</mosaic_0001>

<bundles_post_ra>
// kernel: tpu_custom_call.1
= control target key start
LH: loop header
LB: loop body
LE: loop exit
PB: predicated region body
PF: predicated region fallthrough
CT: control target
= control target key end

     0   :  { %vm69_vm0 = vcmask 1043456   ;;  %vm62_vm1 = vcmask 64512   ;;  %s634_s0 = inlined_call_operand.vmem [shape: bf16[8,128], index: 0, kind: input, shape index: {}]   ;;  %s635_s1 = inlined_call_operand.vmem [shape: bf16[24,8], index: 1, kind: input, shape index: {}]   ;;  %s636_s2 = inlined_call_operand.vmem [shape: bf16[16,4], index: 2, kind: input, shape index: {}]   ;;  %s637_s3 = inlined_call_operand.vmem [shape: f32[4,7], index: 3, kind: input, shape index: {}]   ;;  %s638_s4 = inlined_call_operand.vmem [shape: f32[16,4], index: 4, kind: input, shape index: {}]   ;;  %s639_s5 = inlined_call_operand.hbm [shape: f32[16,128], index: 5, kind: output, shape index: {}]  }
   0x1   :  { %v53_v0 = vld [vmem:[%s634_s0] sm:$0xf]  ;;  %v468_v3 = vld [vmem:[%s635_s1 + $0x8] ss:$0 sps:$4 sm:$0xff]  }
   0x2   :  { %v467_v1 = vld [vmem:[%s635_s1] sm:$0xff]   ;;  %439 = vmatprep.subr.msk.bf16.mxu0 %vm69_vm0, %v53_v0  ;;  %v71_v2 = vsel %vm69_vm0, %v53_v0, 0 }
   0x3   :  { %428 = vmatpush3.bf16.msra.mxu0 %v71_v2  ;;  %429 = vmatprep.mubr.msk.bf16.mxu0 %vm62_vm1, %v467_v1 }
   0x4   :  { %10 = vsyncpa [#allocation3], 0  ;;  %v504_v4 = vmov 0.0   ;;  %v22_v5 = vlaneseq  ;;  %v505_v15 = vmov 0   ;;  %v506_v23 = vmov 1   ;;  %s507_s24 = smov 1  }
   0x5   :  { %433 = vmatprep.subr.bf16.mxu1 %v504_v4  ;;  %454 = vset.pattern.permute.xlu1 %v505_v15  ;;  %v574_v24 = vld [vmem:[%s637_s3] sm:$0xf]  ;;  %v508_v28 = vmov 2   ;;  %v509_v29 = vmov 3   ;;  %v510_v30 = vmov 4   ;;  %s511_s3 = smov 127  }
   0x6   :  { %430 = vmatmul.mubr.msk.bf16.vlgmr.msra.gmra.mxu0 %vm62_vm1, %v468_v3  ;;  %v23_v6 = vand.u32 127, %v22_v5  ;;  %455 = vset.pattern.permute.xlu0 %v506_v23  ;;  %v512_v57 = vmov 5   ;;  %v513_v1 = vmov 6   ;;  %vm514_vm7 = vmmov 0  }
   0x7   :  { %435 = vmatprep.mubr.msk.bf16.mxu1 %vm514_vm7, %v504_v4  ;;  %vm224_vm8 = vcmask 1041408   ;;  %vm220_vm9 = vcmask 31744  }
   0x8   :  { %vm36_vm2 = vcmp.lt.s32.totalorder %v23_v6, 64  ;;  %v28_v39 = vand.u32 31, %v23_v6 }
   0x9   :  { %v564_v9 = vsel %vm36_vm2, 1.0, %v504_v4 }
   0xa   :  { %vm39_vm3 = vcmp.ne.s32.totalorder %v28_v39, 0  ;;  %vm43_vm5 = vcmp.ne.s32.totalorder %v28_v39, 31 }
   0xb   :  { %vm40_vm4 = vmand %vm36_vm2, %vm39_vm3 }
   0xc   :  { %v414_v42 = vsel %vm40_vm4, 1.0, %v504_v4  ;;  %vm44_vm6 = vmand %vm36_vm2, %vm43_vm5 }
   0xd   :  { %v415_v45 = vsel %vm44_vm6, 1.0, %v504_v4 }
  0xc6   :  { %v560_v7 = vpop.f32.mrf.mxu0 }
  0xc8   :  { %v107_v8 = vpop.f32.mrf.mxu0 }
  0xc9   :  { %v121_v10 = vmul.f32 %v564_v9, %v107_v8 }
  0xca   :  { %v432_v11 = vpop.f32.mrf.mxu0 }
  0xcb   :  { %v122_v12 = vsel %vm69_vm0, %v121_v10, 0.0  ;;  %v125_v13 = vmul.f32 %v121_v10, %v121_v10 }
  0xcc   :  { %123 = vadd.xlane.f32.xlu0 %v122_v12  ;;  %v593_v6 = vpop.f32.mrf.mxu0 }
  0xcd   :  { %v126_v14 = vsel %vm69_vm0, %v125_v13, 0.0  ;;  %v332_v13 = vmul.f32 %v560_v7, %v564_v9 }
  0xd0   :  { %127 = vadd.xlane.f32.xlu0 %v126_v14 }
 0x155   :  { %v124_v16 = vpop.xlane.xlu0 %123 }
 0x156   :  { %v129_v17 = vmul.f32 0.015625, %v124_v16 }
 0x158   :  { %v131_v19 = vmul.f32 %v129_v17, %v129_v17 }
 0x159   :  { %v128_v18 = vpop.xlane.xlu0 %127 }
 0x15a   :  { %v130_v20 = vmul.f32 0.015625, %v128_v18 }
 0x15c   :  { %v132_v21 = vsub.f32 %v130_v20, %v131_v19 }
 0x15e   :  { %v133_v22 = vadd.f32 1e-05, %v132_v21  ;;  %v469_v21 = vld [vmem:[%s636_s2] sm:$0xff]  }
 0x160   :  { %470 = vrsqrt.f32 %v133_v22 }
 0x16d   :  { %v471_v25 = vpop.eup %470 }
 0x16e   :  { %v135_v26 = vmul.f32 %v471_v25, %v574_v24 }
 0x170   :  { %v136_v27 = vmul.f32 %v135_v26, %v129_v17 }
 0x172   :  { %138 = vrot.lane.b32.xlu1 %v136_v27, %s507_s24 }
 0x176   :  { %144 = vperm.xlu1 %454, %v135_v26  }
 0x17a   :  { %456 = vset.pattern.permute.xlu1 %v508_v28 }
 0x17b   :  { %163 = vperm.xlu1 %456, %v574_v24  }
 0x17f   :  { %457 = vset.pattern.permute.xlu1 %v509_v29 }
 0x180   :  { %168 = vperm.xlu1 %457, %v574_v24  }
 0x184   :  { %458 = vset.pattern.permute.xlu1 %v510_v30 }
 0x185   :  { %174 = vperm.xlu1 %458, %v574_v24  }
 0x189   :  { %459 = vset.pattern.permute.xlu1 %v512_v57 }
 0x1e4   :  { %v139_v31 = vpop.permute.xlu1 %138 }
 0x1e5   :  { %v141_v32 = vsub.f32 %v574_v24, %v139_v31  ;;  %v338_v31 = vmul.f32 %v332_v13, %v332_v13 }
 0x1e7   :  { %150 = vperm.xlu0 %455, %v141_v32  }
 0x1eb   :  { %460 = vset.pattern.permute.xlu0 %v513_v1  ;;  %v49_v1 = vld [vmem:[%s638_s4 + $0x8] sm:$0xff] }
 0x1f1   :  { %v145_v33 = vpop.permute.xlu1 %144 }
 0x1f2   :  { %v147_v34 = vmul.f32 %v145_v33, %v107_v8  ;;  %v331_v8 = vmul.f32 %v564_v9, %v593_v6 }
 0x1f4   :  { %v337_v10 = vmul.f32 %v331_v8, %v331_v8 }
 0x1f6   :  { %v164_v38 = vpop.permute.xlu1 %163 }
 0x1fb   :  { %v169_v40 = vpop.permute.xlu1 %168 }
 0x200   :  { %v175_v41 = vpop.permute.xlu1 %174 }
 0x262   :  { %v151_v35 = vpop.permute.xlu0 %150 }
 0x263   :  { %v153_v36 = vadd.f32 %v151_v35, %v147_v34 }
 0x265   :  { %v154_v37 = vmax.f32 %v153_v36, 0.0 }
 0x267   :  { %155 = vrot.lane.b32.xlu1 %v154_v37, %s507_s24  ;;  %v171_v48 = vmul.f32 %v169_v40, %v154_v37 }
 0x26b   :  { %158 = vrot.lane.b32.xlu1 %v154_v37, %s511_s3 }
 0x2d9   :  { %v156_v43 = vpop.permute.xlu1 %155 }
 0x2da   :  { %v157_v44 = vmul.f32 %v414_v42, %v156_v43 }
 0x2dc   :  { %v166_v46 = vmul.f32 %v164_v38, %v157_v44 }
 0x2dd   :  { %v159_v47 = vpop.permute.xlu1 %158 }
 0x2de   :  { %v160_v49 = vmul.f32 %v415_v45, %v159_v47  ;;  %v172_v50 = vadd.f32 %v171_v48, %v166_v46 }
 0x2e0   :  { %v177_v51 = vmul.f32 %v175_v41, %v160_v49 }
 0x2e2   :  { %v178_v52 = vadd.f32 %v177_v51, %v172_v50 }
 0x2e4   :  { %v179_v53 = vmul.f32 %v564_v9, %v178_v52 }
 0x2e6   :  { %v180_v54 = vsel %vm69_vm0, %v179_v53, 0.0  ;;  %v183_v55 = vmul.f32 %v179_v53, %v179_v53 }
 0x2e7   :  { %181 = vadd.xlane.f32.xlu1 %v180_v54 }
 0x2e8   :  { %v184_v56 = vsel %vm69_vm0, %v183_v55, 0.0 }
 0x2e9   :  { %185 = vadd.xlane.f32.xlu0 %v184_v56 }
 0x370   :  { %v182_v58 = vpop.xlane.xlu1 %181 }
 0x371   :  { %v187_v59 = vmul.f32 0.015625, %v182_v58 }
 0x372   :  { %v186_v60 = vpop.xlane.xlu0 %185 }
 0x373   :  { %v189_v61 = vmul.f32 %v187_v59, %v187_v59  ;;  %v188_v62 = vmul.f32 0.015625, %v186_v60 }
 0x375   :  { %v190_v63 = vsub.f32 %v188_v62, %v189_v61  ;;  %v48_v61 = vld [vmem:[%s638_s4] sm:$0xff]  ;;  %s515_s4 = smov [#allocation2]  }
 0x376   :  { %s402_s30 = sshll.u32 %s515_s4, 4  ;;  %s403_s30 = int_to_ptr.vmem [resolvable:$true] %s402_s30 }
 0x377   :  { %v191_v0 = vadd.f32 1e-05, %v190_v63  ;;  %s482_s6 = scalar_lea.vmem %s403_s30, 256  ;;  %p487_p1 = scmp.lt.s32.totalorder %s403_s30, %s403_s30 }
 0x378   :  { %p483_p0 = scmp.ne.s32.totalorder %s403_s30, %s482_s6  ;;  %p488_p2 = scmp.lt.s32.totalorder %s482_s6, %s482_s6 }
 0x379   :  { %472 = vrsqrt.f32 %v191_v0 }
 0x37a   :  { %p489_p3 = por %p488_p2, %p487_p1 }
 0x37c   :  { %p490_p4 = pnand %p489_p3, %p483_p0 }
 0x386   :  { %v473_v2 = vpop.eup %472 }
 0x387   :  { %v193_v3 = vmul.f32 %v473_v2, %v574_v24 }
 0x389   :  { %v194_v5 = vmul.f32 %v193_v3, %v187_v59 }
 0x38b   :  { %196 = vrot.lane.b32.xlu1 %v194_v5, %s507_s24 }
 0x38f   :  { %202 = vperm.xlu1 %459, %v193_v3  }
 0x393   :  { %461 = vset.pattern.permute.xlu1 %v508_v28 }
 0x3b3   :  { %333 = vadd.xlane.f32.xlu1 %v331_v8 }
 0x3b7   :  { %339 = vadd.xlane.f32.xlu1 %v337_v10 }
 0x3fd   :  { %v197_v11 = vpop.permute.xlu1 %196 }
 0x3fe   :  { %v199_v12 = vsub.f32 %v574_v24, %v197_v11 }
 0x400   :  { %208 = vperm.xlu0 %460, %v199_v12  }
 0x404   :  { %463 = vset.pattern.permute.xlu0 %v505_v15 }
 0x40a   :  { %v203_v14 = vpop.permute.xlu1 %202 }
 0x40b   :  { %v205_v16 = vmul.f32 %v203_v14, %v178_v52 }
 0x41f   :  { %335 = vadd.xlane.f32.xlu0 %v332_v13 }
 0x43c   :  { %v334_v32 = vpop.xlane.xlu1 %333 }
 0x43d   :  { %v343_v34 = vmul.f32 0.015625, %v334_v32 }
 0x43f   :  { %v347_v36 = vmul.f32 %v343_v34, %v343_v34 }
 0x440   :  { %v340_v33 = vpop.xlane.xlu1 %339 }
 0x441   :  { %v345_v35 = vmul.f32 0.015625, %v340_v33 }
 0x443   :  { %v349_v39 = vsub.f32 %v345_v35, %v347_v36 }
 0x445   :  { %v351_v43 = vadd.f32 1e-05, %v349_v39 }
 0x447   :  { %474 = vrsqrt.f32 %v351_v43 }
 0x454   :  { %v475_v59 = vpop.eup %474 }
 0x455   :  { %v355_v0 = vmul.f32 %v475_v59, %v48_v61 }
 0x457   :  { %v357_v2 = vmul.f32 %v355_v0, %v343_v34 }
 0x47b   :  { %v209_v17 = vpop.permute.xlu0 %208 }
 0x47c   :  { %v211_v18 = vadd.f32 %v209_v17, %v205_v16 }
 0x47e   :  { %v214_v19 = vpack.c.bf16 %v211_v18, %v211_v18 }
 0x480   :  { %v226_v20 = vsel %vm224_vm8, %v214_v19, 0 }
 0x481   :  { %434 = vmatpush3.bf16.msra.mxu1 %v226_v20 }
 0x484   :  { %436 = vmatmul.mubr.msk.bf16.vlgmr.msra.gmra.mxu1 %vm220_vm9, %v469_v21 }
 0x4a8   :  { %v336_v47 = vpop.xlane.xlu0 %335 }
 0x4a9   :  { %v344_v49 = vmul.f32 0.015625, %v336_v47 }
 0x4ab   :  { %v348_v54 = vmul.f32 %v344_v49, %v344_v49 }
 0x544   :  { %v605_v4 = vpop.f32.mrf.mxu1 }
 0x545   :  { %v269_v22 = vmul.f32 %v564_v9, %v605_v4 }
 0x546   :  { %v437_v24 = vpop.f32.mrf.mxu1 }
 0x547   :  { %271 = vadd.xlane.f32.xlu1 %v269_v22  ;;  %v275_v26 = vmul.f32 %v269_v22, %v269_v22 }
 0x548   :  { %v609_v25 = vpop.f32.mrf.mxu1 }
 0x549   :  { %v270_v28 = vmul.f32 %v564_v9, %v609_v25 }
 0x54a   :  { %v438_v27 = vpop.f32.mrf.mxu1 }
 0x54b   :  { %277 = vadd.xlane.f32.xlu1 %v275_v26  ;;  %v276_v30 = vmul.f32 %v270_v28, %v270_v28 }
 0x54f   :  { %273 = vadd.xlane.f32.xlu1 %v270_v28 }
 0x553   :  { %279 = vadd.xlane.f32.xlu1 %v276_v30 }
 0x557   :  { %341 = vadd.xlane.f32.xlu1 %v338_v31 }
 0x5d0   :  { %v272_v37 = vpop.xlane.xlu1 %271 }
 0x5d1   :  { %v281_v38 = vmul.f32 0.015625, %v272_v37 }
 0x5d3   :  { %v285_v41 = vmul.f32 %v281_v38, %v281_v38 }
 0x5d4   :  { %v278_v40 = vpop.xlane.xlu1 %277 }
 0x5d5   :  { %v283_v42 = vmul.f32 0.015625, %v278_v40 }
 0x5d7   :  { %v287_v44 = vsub.f32 %v283_v42, %v285_v41 }
 0x5d8   :  { %v274_v45 = vpop.xlane.xlu1 %273 }
 0x5d9   :  { %v289_v9 = vadd.f32 1e-05, %v287_v44  ;;  %v282_v46 = vmul.f32 0.015625, %v274_v45 }
 0x5db   :  { %476 = vrsqrt.f32 %v289_v9  ;;  %v286_v50 = vmul.f32 %v282_v46, %v282_v46 }
 0x5dc   :  { %v280_v48 = vpop.xlane.xlu1 %279 }
 0x5dd   :  { %v284_v51 = vmul.f32 0.015625, %v280_v48 }
 0x5df   :  { %v288_v52 = vsub.f32 %v284_v51, %v286_v50 }
 0x5e0   :  { %v342_v53 = vpop.xlane.xlu1 %341 }
 0x5e1   :  { %v290_v55 = vadd.f32 1e-05, %v288_v52  ;;  %v346_v56 = vmul.f32 0.015625, %v342_v53 }
 0x5e3   :  { %478 = vrsqrt.f32 %v290_v55  ;;  %v350_v57 = vsub.f32 %v346_v56, %v348_v54 }
 0x5e5   :  { %v352_v58 = vadd.f32 1e-05, %v350_v57 }
 0x5e7   :  { %480 = vrsqrt.f32 %v352_v58 }
 0x5e8   :  { %v477_v60 = vpop.eup %476 }
 0x5e9   :  { %v293_v62 = vmul.f32 %v477_v60, %v48_v61 }
 0x5eb   :  { %v295_v63 = vmul.f32 %v293_v62, %v281_v38 }
 0x5ed   :  { %299 = vrot.lane.b32.xlu1 %v295_v63, %s507_s24 }
 0x5f0   :  { %v479_v3 = vpop.eup %478 }
 0x5f1   :  { %361 = vrot.lane.b32.xlu1 %v357_v2, %s507_s24  ;;  %v294_v5 = vmul.f32 %v479_v3, %v49_v1 }
 0x5f3   :  { %v296_v8 = vmul.f32 %v294_v5, %v282_v46 }
 0x5f4   :  { %v481_v10 = vpop.eup %480 }
 0x5f5   :  { %301 = vrot.lane.b32.xlu0 %v296_v8, %s507_s24  ;;  %v356_v11 = vmul.f32 %v481_v10, %v49_v1 }
 0x5f7   :  { %v358_v12 = vmul.f32 %v356_v11, %v344_v49 }
 0x5f9   :  { %376 = vperm.xlu0 %463, %v356_v11   ;;  %363 = vrot.lane.b32.xlu1 %v358_v12, %s507_s24 }
 0x5fd   :  { %309 = vperm.xlu1 %461, %v293_v62   ;;  %465 = vset.pattern.permute.xlu0 %v506_v23 }
 0x601   :  { %314 = vperm.xlu1 %461, %v294_v5  }
 0x605   :  { %462 = vset.pattern.permute.xlu1 %v505_v15 }
 0x606   :  { %371 = vperm.xlu1 %462, %v355_v0  }
 0x60a   :  { %464 = vset.pattern.permute.xlu1 %v509_v29 }
 0x65f   :  { %v300_v13 = vpop.permute.xlu1 %299 }
 0x660   :  { %v305_v14 = vsub.f32 %v48_v61, %v300_v13 }
 0x662   :  { %321 = vperm.xlu1 %464, %v305_v14  }
 0x663   :  { %v362_v16 = vpop.permute.xlu1 %361 }
 0x664   :  { %v367_v17 = vsub.f32 %v48_v61, %v362_v16 }
 0x666   :  { %383 = vperm.xlu0 %465, %v367_v17  }
 0x667   :  { %v302_v18 = vpop.permute.xlu0 %301 }
 0x668   :  { %v306_v19 = vsub.f32 %v49_v1, %v302_v18 }
 0x66a   :  { %326 = vperm.xlu1 %464, %v306_v19  }
 0x66b   :  { %v364_v20 = vpop.permute.xlu1 %363 }
 0x66c   :  { %v368_v21 = vsub.f32 %v49_v1, %v364_v20 }
 0x66e   :  { %466 = vset.pattern.permute.xlu1 %v506_v23 }
 0x66f   :  { %388 = vperm.xlu1 %466, %v368_v21  }
 0x674   :  { %v377_v26 = vpop.permute.xlu0 %376 }
 0x675   :  { %v380_v35 = vmul.f32 %v560_v7, %v377_v26 }
 0x678   :  { %v310_v22 = vpop.permute.xlu1 %309 }
 0x679   :  { %v317_v29 = vmul.f32 %v310_v22, %v605_v4 }
 0x67c   :  { %v315_v24 = vpop.permute.xlu1 %314 }
 0x67d   :  { %v318_v23 = vmul.f32 %v315_v24, %v609_v25 }
 0x681   :  { %v372_v15 = vpop.permute.xlu1 %371 }
 0x682   :  { %v379_v28 = vmul.f32 %v372_v15, %v593_v6 }
 0x6dd   :  { %v322_v27 = vpop.permute.xlu1 %321 }
 0x6de   :  { %v329_v31 = vadd.f32 %v322_v27, %v317_v29 }
 0x6e1   :  { %v384_v30 = vpop.permute.xlu0 %383 }
 0x6e2   :  { %v391_v32 = vadd.f32 %v384_v30, %v379_v28 }
 0x6e4   :  { %v393_v33 = vadd.f32 %v391_v32, %v329_v31 }
 0x6e5   :  { %v327_v34 = vpop.permute.xlu1 %326 }
 0x6e6   :  { %395 = vst [vmem:[#allocation2] sm:$0xff] %v393_v33  ;;  %v330_v37 = vadd.f32 %v327_v34, %v318_v23 }
 0x6ea   :  { %v389_v36 = vpop.permute.xlu1 %388 }
 0x6eb   :  { %v392_v38 = vadd.f32 %v389_v36, %v380_v35 }
 0x6ed   :  { %v394_v39 = vadd.f32 %v392_v38, %v330_v37 }
 0x6ef   :  { %396 = vst [vmem:[#allocation2 + $0x8] sm:$0xff] %v394_v39 }
 0x6f0   :  { %493 = shalt.err (!%p490_p4)
}
 0x6f1   :  { %s516_s7 = smov 128   ;;  %s517_s8 = smov 8  }
 0x6f2   :  { %408 = dma.vmem_to_hbm [thread:$0]  %s403_s30, 256, %s639_s5, [#allocation3], %s516_s7, %s516_s7, %s517_s8  }
 0x6f3   :  { %502 = dma.done.wait [#allocation3], 256  }
 0x6f4   :  { %503 = vsyncadd [#allocation3], 4294967040 }
 0x6f5   :  { %412 = vsyncpa [#allocation3], 1 }

</bundles_post_ra>
